<compile_context>
chip_gen: v7x
topology: tpu7x:2x2x1
jax: 0.10.0
libtpu: 0.0.40
codegen_flags: <defaults>
</compile_context>

<pallas_src>
import functools

import jax
import jax.numpy as jnp
from jax import lax
from jax.experimental import pallas as pl
from jax.experimental.pallas import tpu as pltpu


def _rbf_tile_kernel(fac_ref, xr_ref, xc_ref, sqr_ref, sqc_ref, out_ref, *,
                     n_kernels, ratio2):
    """One (tm, tn) output tile of sum_k exp(-||xi - xj||^2 / (bw * mult_k)).

    fac_ref (SMEM, [n_kernels]) holds precomputed -1/(bw*mult_k), sorted by
    increasing multiplier (so fac_ref[n_kernels-1] has the smallest magnitude).
    """
    # MXU-native gram: contract the last (lane) dim of both operands, f32 accum.
    gram = lax.dot_general(
        xr_ref[...], xc_ref[...],
        dimension_numbers=(((1,), (1,)), ((), ())),
        preferred_element_type=jnp.float32,
    )
    # [tm,1] + [1,tn] - [tm,tn]; clamp fp cancellation error.
    d2 = jnp.maximum(sqr_ref[...] + sqc_ref[...] - 2.0 * gram, 0.0)

    if ratio2:
        # Multipliers geometric with ratio 2: one EUP exp per element, the
        # other kernels via VPU repeated squaring (exp(c), exp(2c)=e^2, ...).
        term = jnp.exp(d2 * fac_ref[n_kernels - 1])   # largest-multiplier term
        acc = term
        for _ in range(n_kernels - 1):
            term = term * term                         # VPU, EUP slot stays free
            acc = acc + term
    else:
        # General multipliers: one exp per kernel, hoisted scalar factors.
        acc = jnp.exp(d2 * fac_ref[0])
        for k in range(1, n_kernels):
            acc = acc + jnp.exp(d2 * fac_ref[k])
    out_ref[...] = acc


def _vmem_budget():
    """(per-step tile budget bytes, vmem_limit_bytes) — generation-aware."""
    cap = None
    try:
        cap = getattr(pltpu.get_tpu_info(), "vmem_capacity_bytes", None)
    except Exception:  # query unavailable -> stay conservative
        cap = None
    if cap is not None and cap >= 96 * 1024 * 1024:
        # v5e / v6e: 128 MiB VMEM per TensorCore -> roomier tiles.
        return 40 * 1024 * 1024, 56 * 1024 * 1024
    # v7x (64 MiB per TC) or unknown: conservative, still double-buffered.
    return 20 * 1024 * 1024, 32 * 1024 * 1024


def _pick_tiles(n, d, budget_bytes):
    """Pick (tm, tn) dividing n (n is a multiple of 128) within the VMEM budget."""
    def step_bytes(tm, tn):
        x_bytes = 2 * (tm + tn) * d * 4          # double-buffered row/col X tiles
        out_bytes = 2 * tm * tn * 4              # double-buffered output tile
        tmp_bytes = 3 * tm * tn * 4              # d2 / exp f32 temporaries
        sq_bytes = 2 * (tm * 128 + 8 * tn) * 4   # layout-padded norm vectors
        return x_bytes + out_bytes + tmp_bytes + sq_bytes

    candidates = [t for t in (1024, 512, 256, 128) if n % t == 0]
    # Lane (last-dim) tile: keep output stores lane-dense; 512 is enough.
    tn = next((t for t in candidates
               if t <= 512 and step_bytes(128, t) <= budget_bytes), 128)
    # Row tile: grow as far as the budget allows — this is what cuts xc
    # re-streaming from HBM (read traffic ~ N^2 * D / tm).
    tm = next((t for t in candidates if step_bytes(t, tn) <= budget_bytes), 128)
    return tm, tn


def rbf_forward(x, n_kernels=3, mul_factor=2.0, bandwidth=None,
                tile_m=None, tile_n=None):
    """Pallas equivalent of RBF.forward. x: [N, D] -> [N, N] float32."""
    n, d = x.shape
    xf32 = x.astype(jnp.float32)
    sq_full = jnp.sum(xf32 * xf32, axis=1)                     # [N]

    # get_bandwidth(): sum_{i,j}||xi-xj||^2 / (N^2 - N), closed form (no kernel).
    if bandwidth is None:
        col_sum = jnp.sum(xf32, axis=0)
        d2_sum = 2.0 * n * jnp.sum(sq_full) - 2.0 * jnp.sum(col_sum * col_sum)
        bw = d2_sum / jnp.float32(n * n - n)   # same degenerate-input hazard as the reference
    else:
        bw = jnp.float32(bandwidth)

    # bandwidth_multipliers = mul_factor ** (arange(n_kernels) - n_kernels // 2)
    multipliers = tuple(
        float(mul_factor ** (k - n_kernels // 2)) for k in range(n_kernels))
    mult_arr = jnp.asarray(multipliers, dtype=jnp.float32)
    factors = (-1.0 / (bw * mult_arr)).astype(jnp.float32)     # [n_kernels], SMEM
    ratio2 = (n_kernels == 1) or abs(float(mul_factor) - 2.0) < 1e-12

    # ---- Tiling / padding --------------------------------------------------
    budget, vmem_limit = _vmem_budget()
    if n % 128 == 0 or n <= 256:
        n_pad = n                       # already tileable, or single full block
    else:
        n_pad = -(-n // 128) * 128      # pad-and-slice keeps the pipelined path

    x_work = x if n_pad == n else jnp.pad(x, ((0, n_pad - n), (0, 0)))
    xw32 = x_work.astype(jnp.float32)
    sq = jnp.sum(xw32 * xw32, axis=1)
    sq_col = sq.reshape(n_pad, 1)       # lane-broadcast view (||x_i||^2)
    sq_row = sq.reshape(1, n_pad)       # sublane-broadcast view (||x_j||^2)

    if n_pad % 128 == 0:
        tm, tn = _pick_tiles(n_pad, d, budget)
    else:
        tm = tn = n_pad                 # small N: one full-extent block
    if tile_m is not None:
        tm = tile_m
    if tile_n is not None:
        tn = tile_n
    assert n_pad % tm == 0 and n_pad % tn == 0, (n_pad, tm, tn)

    grid = (n_pad // tm, n_pad // tn)
    kernel = functools.partial(_rbf_tile_kernel, n_kernels=n_kernels, ratio2=ratio2)

    out = pl.pallas_call(
        kernel,
        out_shape=jax.ShapeDtypeStruct((n_pad, n_pad), jnp.float32),
        grid=grid,
        in_specs=[
            pl.BlockSpec(memory_space=pltpu.MemorySpace.SMEM),   # -1/(bw*m_k)
            pl.BlockSpec((tm, d), lambda i, j: (i, 0)),          # row tile of X
            pl.BlockSpec((tn, d), lambda i, j: (j, 0)),          # col tile of X
            pl.BlockSpec((tm, 1), lambda i, j: (i, 0)),          # ||x_i||^2
            pl.BlockSpec((1, tn), lambda i, j: (0, j)),          # ||x_j||^2
        ],
        out_specs=pl.BlockSpec((tm, tn), lambda i, j: (i, j)),
        compiler_params=pltpu.CompilerParams(
            dimension_semantics=("parallel", "parallel"),
            vmem_limit_bytes=vmem_limit),
    )(factors, x_work, x_work, sq_col, sq_row)

    # TODO(synk): optional symmetry exploit (compute only j>=i tiles + XLU
    # transpose for the mirror block) — skipped; EUP fix already applied.
    if n_pad != n:
        out = out[:n, :n]
    return out


def _rbf_reference(x, n_kernels=3, mul_factor=2.0, bandwidth=None):
    """Pure-JAX reference mirroring the PyTorch module."""
    n = x.shape[0]
    mults = mul_factor ** (jnp.arange(n_kernels, dtype=jnp.float32) - n_kernels // 2)
    diff = x[:, None, :] - x[None, :, :]
    d2 = jnp.sum(diff * diff, axis=-1)
    bw = jnp.sum(d2) / (n * n - n) if bandwidth is None else jnp.float32(bandwidth)
    return jnp.sum(jnp.exp(-d2[None, ...] / (bw * mults)[:, None, None]), axis=0)


if __name__ == "__main__":
    key = jax.random.PRNGKey(0)

    # Small "point cloud": N=16, D=32 (single full-extent block).
    x_small = jax.random.normal(key, (16, 32), dtype=jnp.float32)
    out_small = jax.block_until_ready(rbf_forward(x_small))
    ref_small = _rbf_reference(x_small)
    assert out_small.shape == (16, 16), out_small.shape
    assert jnp.allclose(out_small, ref_small, rtol=1e-4, atol=1e-4), "small mismatch"

    # Tiled path: force a 2x2 grid of 128x128 lane-dense output tiles.
    x_big = jax.random.normal(jax.random.PRNGKey(0), (256, 64), dtype=jnp.float32)
    out_big = jax.block_until_ready(rbf_forward(x_big, tile_m=128, tile_n=128))
    ref_big = _rbf_reference(x_big)
    assert jnp.allclose(out_big, ref_big, rtol=1e-4, atol=1e-4), "tiled mismatch"

    # Fixed-bandwidth path (skips the data-dependent bandwidth math).
    out_fixed = jax.block_until_ready(rbf_forward(x_small, bandwidth=1.5))
    ref_fixed = _rbf_reference(x_small, bandwidth=1.5)
    assert jnp.allclose(out_fixed, ref_fixed, rtol=1e-4, atol=1e-4), "fixed-bw mismatch"

    # n_kernels=5 with mul_factor=2 exercises the generalized repeated-squaring
    # path; mul_factor=3 exercises the general (one-exp-per-kernel) path.
    out_k5 = jax.block_until_ready(rbf_forward(x_small, n_kernels=5))
    ref_k5 = _rbf_reference(x_small, n_kernels=5)
    assert jnp.allclose(out_k5, ref_k5, rtol=1e-4, atol=1e-4), "k5 mismatch"
    out_m3 = jax.block_until_ready(rbf_forward(x_small, n_kernels=3, mul_factor=3.0))
    ref_m3 = _rbf_reference(x_small, n_kernels=3, mul_factor=3.0)
    assert jnp.allclose(out_m3, ref_m3, rtol=1e-4, atol=1e-4), "mul3 mismatch"

    print("KERNEL_OK")
</pallas_src>

<mosaic_0001>
module attributes {stable_mosaic.version = 11 : i64} {
  func.func @_rbf_tile_kernel(%arg0: i32, %arg1: i32, %arg2: memref<3xf32, #tpu.memory_space<smem>>, %arg3: memref<16x32xf32, #tpu.memory_space<vmem>>, %arg4: memref<16x32xf32, #tpu.memory_space<vmem>>, %arg5: memref<16x1xf32, #tpu.memory_space<vmem>>, %arg6: memref<1x16xf32, #tpu.memory_space<vmem>>, %arg7: memref<16x16xf32, #tpu.memory_space<vmem>>) attributes {dimension_semantics = [#tpu.dimension_semantics<parallel>, #tpu.dimension_semantics<parallel>], iteration_bounds = array<i64: 1, 1>, scalar_prefetch = 0 : i64, scratch_operands = 0 : i64, tpu.core_type = #tpu.core_type<tc>, window_params = [{transform_indices = @transform_0, window_bounds = array<i64: 3>}, {transform_indices = @transform_1, window_bounds = array<i64: 16, 32>}, {transform_indices = @transform_2, window_bounds = array<i64: 16, 32>}, {transform_indices = @transform_3, window_bounds = array<i64: 16, 1>}, {transform_indices = @transform_4, window_bounds = array<i64: 1, 16>}, {transform_indices = @transform_5, window_bounds = array<i64: 16, 16>}]} {
    %c0 = arith.constant 0 : index
    %c0_0 = arith.constant 0 : index
    %0 = vector.load %arg3[%c0, %c0_0] : memref<16x32xf32, #tpu.memory_space<vmem>>, vector<16x32xf32>
    %c0_1 = arith.constant 0 : index
    %c0_2 = arith.constant 0 : index
    %1 = vector.load %arg4[%c0_1, %c0_2] : memref<16x32xf32, #tpu.memory_space<vmem>>, vector<16x32xf32>
    %cst = arith.constant dense<0.000000e+00> : vector<16x16xf32>
    %2 = tpu.matmul %0, %1, %cst {dimension_numbers = #tpu.dot_dimension_numbers<[1], [1], [0], [0], [0, 0, 1, 0], [], []>} : vector<16x32xf32>, vector<16x32xf32>, vector<16x16xf32> -> vector<16x16xf32>
    %c0_3 = arith.constant 0 : index
    %c0_4 = arith.constant 0 : index
    %3 = vector.load %arg5[%c0_3, %c0_4] : memref<16x1xf32, #tpu.memory_space<vmem>>, vector<16x1xf32>
    %c0_5 = arith.constant 0 : index
    %c0_6 = arith.constant 0 : index
    %4 = vector.load %arg6[%c0_5, %c0_6] : memref<1x16xf32, #tpu.memory_space<vmem>>, vector<1x16xf32>
    %5 = vector.broadcast %3 : vector<16x1xf32> to vector<16x16xf32>
    %6 = vector.broadcast %4 : vector<1x16xf32> to vector<16x16xf32>
    %7 = arith.addf %5, %6 : vector<16x16xf32>
    %cst_7 = arith.constant 2.000000e+00 : f32
    %8 = vector.broadcast %cst_7 : f32 to vector<16x16xf32>
    %9 = arith.mulf %8, %2 : vector<16x16xf32>
    %10 = arith.subf %7, %9 : vector<16x16xf32>
    %cst_8 = arith.constant 0.000000e+00 : f32
    %11 = vector.broadcast %cst_8 : f32 to vector<16x16xf32>
    %12 = arith.maximumf %10, %11 : vector<16x16xf32>
    %c2 = arith.constant 2 : index
    %13 = memref.load %arg2[%c2] : memref<3xf32, #tpu.memory_space<smem>>
    %14 = vector.broadcast %13 : f32 to vector<16x16xf32>
    %15 = arith.mulf %12, %14 : vector<16x16xf32>
    %16 = math.exp %15 : vector<16x16xf32>
    %17 = arith.mulf %16, %16 : vector<16x16xf32>
    %18 = arith.addf %16, %17 : vector<16x16xf32>
    %19 = arith.mulf %17, %17 : vector<16x16xf32>
    %20 = arith.addf %18, %19 : vector<16x16xf32>
    %c0_9 = arith.constant 0 : index
    %c0_10 = arith.constant 0 : index
    %21 = vector.load %arg7[%c0_9, %c0_10] : memref<16x16xf32, #tpu.memory_space<vmem>>, vector<16x16xf32>
    tpu.vector_store %arg7[%c0_9, %c0_10], %20 {strides = array<i32>} : memref<16x16xf32, #tpu.memory_space<vmem>>, vector<16x16xf32>,
    return
  }
  func.func @transform_0(%arg0: i32, %arg1: i32) -> i32 {
    %c0_i32 = arith.constant 0 : i32
    %c0_i32_0 = arith.constant 0 : i32
    return %c0_i32 : i32
  }
  func.func @transform_1(%arg0: i32, %arg1: i32) -> (i32, i32) {
    %c0_i32 = arith.constant 0 : i32
    %c0_i32_0 = arith.constant 0 : i32
    return %arg0, %c0_i32 : i32, i32
  }
  func.func @transform_2(%arg0: i32, %arg1: i32) -> (i32, i32) {
    %c0_i32 = arith.constant 0 : i32
    %c0_i32_0 = arith.constant 0 : i32
    return %arg1, %c0_i32 : i32, i32
  }
  func.func @transform_3(%arg0: i32, %arg1: i32) -> (i32, i32) {
    %c0_i32 = arith.constant 0 : i32
    %c0_i32_0 = arith.constant 0 : i32
    return %arg0, %c0_i32 : i32, i32
  }
  func.func @transform_4(%arg0: i32, %arg1: i32) -> (i32, i32) {
    %c0_i32 = arith.constant 0 : i32
    %c0_i32_0 = arith.constant 0 : i32
    return %c0_i32, %arg1 : i32, i32
  }
  func.func @transform_5(%arg0: i32, %arg1: i32) -> (i32, i32) {
    %c0_i32 = arith.constant 0 : i32
    return %arg0, %arg1 : i32, i32
  }
}

</mosaic_0001>

<bundles_post_ra>
// kernel: tpu_custom_call.1
= control target key start
LH: loop header
LB: loop body
LE: loop exit
PB: predicated region body
PF: predicated region fallthrough
CT: control target
= control target key end

     0   :  { %10 = vsyncpa [#allocation5], 0  ;;  %s384_s0 = inlined_call_operand.vmem [shape: f32[3], index: 0, kind: input, shape index: {}]   ;;  %s385_s1 = inlined_call_operand.vmem [shape: f32[16,32], index: 1, kind: input, shape index: {}]   ;;  %s386_s2 = inlined_call_operand.hbm [shape: f32[16,32], index: 2, kind: input, shape index: {}]   ;;  %s387_s3 = inlined_call_operand.vmem [shape: f32[16,1], index: 3, kind: input, shape index: {}]   ;;  %s388_s4 = inlined_call_operand.vmem [shape: f32[1,16], index: 4, kind: input, shape index: {}]   ;;  %s389_s5 = inlined_call_operand.hbm [shape: f32[16,16], index: 5, kind: output, shape index: {}]  }
   0x1   :  { %11 = vsyncpa [#allocation3], 0 }
   0x2   :  { %12 = vsyncpa [#allocation4], 0  ;;  %s19_s20 = sshll.u32 %s384_s0, 4  ;;  %s20_s20 = int_to_ptr.vmem [resolvable:$true] %s19_s20 }
   0x3   :  { %s238_s21 = scalar_lea.vmem %s20_s20, 16  ;;  %p243_p1 = scmp.lt.s32.totalorder %s20_s20, %s20_s20 }
   0x4   :  { %p239_p0 = scmp.ne.s32.totalorder %s20_s20, %s238_s21  ;;  %p244_p2 = scmp.lt.s32.totalorder %s238_s21, %s238_s21 }
   0x6   :  { %p245_p3 = por %p244_p2, %p243_p1 }
   0x8   :  { %p246_p4 = pnand %p245_p3, %p239_p0 }
   0xa   :  { %249 = shalt.err (!%p246_p4)
}
   0xb   :  { %s300_s22 = smov [#allocation2]   ;;  %s301_s23 = smov [#allocation6]  }
   0xc   :  { %22 = dma.vmem_to_smem %s20_s20, 16, %s300_s22, [#allocation5]  }
   0xd   :  { %s30_s24 = sshll.u32 %s301_s23, 4  ;;  %s250_s27 = scalar_lea.hbm %s386_s2, 256  ;;  %s31_s24 = int_to_ptr.vmem [resolvable:$true] %s30_s24 }
   0xe   :  { %p251_p5 = scmp.ne.s32.totalorder %s386_s2, %s250_s27  ;;  %p254_p6 = scmp.lt.u32.totalorder %s250_s27, %s386_s2 }
  0x10   :  { %p256_p7 = pnand %p254_p6, %p251_p5 }
  0x12   :  { %259 = shalt.err (!%p256_p7)
}
  0x13   :  { %s260_s6 = scalar_lea.vmem %s31_s24, 256  ;;  %p265_p9 = scmp.lt.s32.totalorder %s31_s24, %s31_s24 }
  0x14   :  { %p261_p8 = scmp.ne.s32.totalorder %s31_s24, %s260_s6  ;;  %p266_p10 = scmp.lt.s32.totalorder %s260_s6, %s260_s6 }
  0x16   :  { %p267_p11 = por %p266_p10, %p265_p9 }
  0x18   :  { %p268_p12 = pnand %p267_p11, %p261_p8 }
  0x1a   :  { %271 = shalt.err (!%p268_p12)
}
  0x1b   :  { %s302_s7 = smov 128   ;;  %s303_s8 = smov 8  }
  0x1c   :  { %36 = dma.hbm_to_vmem [thread:$0]  %s386_s2, 256, %s31_s24, [#allocation3], %s302_s7, %s302_s7, %s303_s8  }
  0x1d   :  { %294 = dma.done.wait [#allocation5], 16  }
  0x1e   :  { %295 = vsyncadd [#allocation5], 4294967280 }
  0x1f   :  { %296 = dma.done.wait [#allocation3], 256  }
  0x20   :  { %297 = vsyncadd [#allocation3], 4294967040 }
  0x21   :  { %47 = sfence }
  0x22   :  { %v50_v0 = vld [vmem:[#allocation6] sm:$0xff]  ;;  %v51_v1 = vld [vmem:[#allocation6 + $0x8] sm:$0xff]  ;;  %vm52_vm0 = vcmask 261120   ;;  %v304_v4 = vmov 0   ;;  %s209_s18 = sld [smem:[#allocation2 + $0x2]]  ;;  %vm183_vm2 = vcmask 130048  }
  0x23   :  { %v48_v2 = vld [vmem:[%s385_s1] sm:$0xff]  ;;  %v221_v3 = vpack.c.bf16 %v51_v1, %v50_v0  ;;  %vm222_vm1 = vmpackc.low %vm52_vm0, %vm52_vm0  ;;  %233 = vset.pattern.permute.xlu0 %v304_v4  ;;  %v141_v6 = vld [vmem:[%s387_s3 + $0x8] sm:$0xff] }
  0x24   :  { %218 = vmatprep.mubr.msk.f32.mxu0 %vm52_vm0, %v48_v2  ;;  %v140_v5 = vld [vmem:[%s387_s3] sm:$0xff]  ;;  %v49_v7 = vld [vmem:[%s385_s1 + $0x8] sm:$0xff]  ;;  %s305_s1 = smov [#allocation7]  }
  0x25   :  { %145 = vperm.xlu0 %233, %v140_v5   ;;  %223 = vmatprep.subr.msk.bf16.mxu0 %vm222_vm1, %v221_v3  ;;  %v208_v9 = vld [vmem:[%s388_s4] ss:$0 sm:$0xff]  ;;  %s191_s3 = sshll.u32 %s305_s1, 4  ;;  %s192_s3 = int_to_ptr.vmem [resolvable:$true] %s191_s3 }
  0x26   :  { %226 = vmatpush3.bf16.xpose.msk.msra.mxu0 %vm222_vm1, %v221_v3  ;;  %s272_s4 = scalar_lea.vmem %s192_s3, 256  ;;  %p277_p0 = scmp.lt.s32.totalorder %s192_s3, %s192_s3 }
  0x27   :  { %p273_p13 = scmp.ne.s32.totalorder %s192_s3, %s272_s4  ;;  %p278_p1 = scmp.lt.s32.totalorder %s272_s4, %s272_s4 }
  0x28   :  { %v168_v18 = vstv %s209_s18 }
  0x29   :  { %150 = vperm.xlu0 %233, %v141_v6   ;;  %p279_p2 = por %p278_p1, %p277_p0 }
  0x2b   :  { %p280_p3 = pnand %p279_p2, %p273_p13 }
  0x2d   :  { %219 = vmatmul.mubr.msk.f32.vlgmr.msra.gmra.mrb[0].mxu0 %vm52_vm0, %v49_v7 }
  0xa4   :  { %v146_v8 = vpop.permute.xlu0 %145 }
  0xa5   :  { %v159_v15 = vadd.f32 %v208_v9, %v146_v8 }
  0xa8   :  { %v151_v10 = vpop.permute.xlu0 %150 }
  0xa9   :  { %v160_v12 = vadd.f32 %v208_v9, %v151_v10 }
 0x100   :  { %v220_v11 = vpop.f32.mrb[0].mxu0 }
 0x101   :  { %v162_v13 = vmul.f32 2.0, %v220_v11  ;;  %v131_v14 = vpop.f32.mrb[1].mxu0 }
 0x102   :  { %v161_v16 = vmul.f32 2.0, %v131_v14 }
 0x103   :  { %v164_v17 = vsub.f32 %v160_v12, %v162_v13 }
 0x104   :  { %v163_v19 = vsub.f32 %v159_v15, %v161_v16 }
 0x105   :  { %v166_v20 = vmax.f32 %v164_v17, 0.0 }
 0x106   :  { %v165_v21 = vmax.f32 %v163_v19, 0.0 }
 0x107   :  { %v170_v22 = vmul.f32 %v168_v18, %v166_v20 }
 0x108   :  { %v169_v23 = vmul.f32 %v168_v18, %v165_v21 }
 0x109   :  { %v173_v24 = vmul.f32 1.442695, %v170_v22 }
 0x10a   :  { %v171_v25 = vmul.f32 1.442695, %v169_v23 }
 0x10b   :  { %234 = vpow2.f32 %v173_v24 }
 0x10c   :  { %236 = vpow2.f32 %v171_v25 }
 0x115   :  { %v235_v26 = vpop.eup %234 }
 0x116   :  { %v237_v27 = vpop.eup %236  ;;  %v176_v28 = vmul.f32 %v235_v26, %v235_v26 }
 0x117   :  { %v175_v29 = vmul.f32 %v237_v27, %v237_v27 }
 0x118   :  { %v178_v30 = vadd.f32 %v235_v26, %v176_v28  ;;  %v180_v31 = vmul.f32 %v176_v28, %v176_v28 }
 0x119   :  { %v177_v32 = vadd.f32 %v237_v27, %v175_v29  ;;  %v179_v33 = vmul.f32 %v175_v29, %v175_v29 }
 0x11a   :  { %v182_v34 = vadd.f32 %v180_v31, %v178_v30 }
 0x11b   :  { %v181_v35 = vadd.f32 %v179_v33, %v177_v32 }
 0x11c   :  { %185 = vst.msk [vmem:[#allocation7 + $0x8] sm:$0xff] %vm183_vm2, %v182_v34 }
 0x11d   :  { %184 = vst.msk [vmem:[#allocation7] sm:$0xff] %vm183_vm2, %v181_v35 }
 0x11e   :  { %283 = shalt.err (!%p280_p3)
}
 0x11f   :  { %s284_s23 = scalar_lea.hbm %s389_s5, 256 }
 0x120   :  { %p285_p4 = scmp.ne.s32.totalorder %s389_s5, %s284_s23  ;;  %p288_p5 = scmp.lt.u32.totalorder %s284_s23, %s389_s5 }
 0x122   :  { %p290_p6 = pnand %p288_p5, %p285_p4 }
 0x124   :  { %293 = shalt.err (!%p290_p6)
}
 0x125   :  { %197 = dma.vmem_to_hbm [thread:$0]  %s192_s3, 256, %s389_s5, [#allocation4], %s302_s7, %s302_s7, %s303_s8  }
 0x126   :  { %298 = dma.done.wait [#allocation4], 256  }
 0x127   :  { %299 = vsyncadd [#allocation4], 4294967040 }
 0x128   :  { %201 = vsyncpa [#allocation3], 1 }
 0x129   :  { %202 = vsyncpa [#allocation4], 1 }
 0x12a   :  { %203 = vsyncpa [#allocation5], 1 }

</bundles_post_ra>
